<compile_context>
chip_gen: v5e
topology: v5e:2x2
jax: 0.10.0
libtpu: 0.0.40
codegen_flags: <defaults>
</compile_context>

<pallas_src>
import functools

import jax
import jax.numpy as jnp
import numpy as np
from jax.experimental import pallas as pl
from jax.experimental.pallas import tpu as pltpu


# ----------------------------------------------------------------------------
# Fused FPS + KNN + center-relative normalization kernel (Bt batch rows/step).
#   xyz_ref  : (Bt, 3, N)    f32  -- channel-first points (N lane-dense)
#   nbr_ref  : (Bt, 3*K, G)  f32  -- neighborhoods, row (3*k + c), lane = G
#   ctr_ref  : (Bt, 3, G)    f32  -- centers, channel-first, lane = G
#   dist_ref : (Bt, G, N)    f32  -- VMEM scratch: |x_n - c_g|^2
# Deterministic: FPS starts at point 0; all ties broken by smallest index.
# ----------------------------------------------------------------------------
def grouper_kernel(xyz_ref, nbr_ref, ctr_ref, dist_ref):
    bt, _, n = xyz_ref.shape
    g_total = dist_ref.shape[1]
    k_total = nbr_ref.shape[1] // 3

    xyz3 = xyz_ref[...]                                   # (Bt, 3, N)
    n_i32 = jnp.int32(n)
    big = jnp.finfo(jnp.float32).max

    iota_1n = jax.lax.broadcasted_iota(jnp.int32, (bt, 1, n), 2)   # (Bt,1,N)

    # ---------------- Farthest point sampling ----------------
    # Each iteration writes the exact squared-distance row of the freshly
    # selected center into dist_ref; that matrix is reused verbatim for KNN.
    def fps_body(gi, carry):
        mindist, far = carry                              # (Bt,1,N), (Bt,1,1)
        # Extract the selected point (masked sum keeps the serial chain short
        # and avoids lane-dim dynamic slicing, which is fragile to lower).
        sel_mask = (iota_1n == far).astype(xyz3.dtype)    # (Bt,1,N)
        pt = jnp.sum(xyz3 * sel_mask, axis=2, keepdims=True)       # (Bt,3,1)
        # Exact squared distance from this center to every point.
        d = jnp.sum((xyz3 - pt) ** 2, axis=1, keepdims=True)       # (Bt,1,N)
        dist_ref[:, pl.ds(gi, 1), :] = d
        # Running min-distance to the selected set; next farthest = argmax
        # (ties -> smallest index).
        mindist = jnp.minimum(mindist, d)
        maxv = jnp.max(mindist, axis=2, keepdims=True)    # (Bt,1,1)
        cand = jnp.where(mindist == maxv, iota_1n, n_i32)
        far_new = jnp.min(cand, axis=2, keepdims=True)    # (Bt,1,1) int32
        return mindist, far_new

    mindist0 = jnp.full((bt, 1, n), big, dtype=jnp.float32)
    far0 = jnp.zeros((bt, 1, 1), dtype=jnp.int32)
    jax.lax.fori_loop(0, g_total, fps_body, (mindist0, far0))

    # ---------------- KNN grouping + normalization ----------------
    dist = dist_ref[...]                                  # (Bt, G, N)
    iota_gn = jax.lax.broadcasted_iota(jnp.int32, (bt, g_total, n), 2)

    ctr3g = None
    for k in range(k_total):                              # K small: unrolled
        minv = jnp.min(dist, axis=2, keepdims=True)       # (Bt,G,1)
        cand = jnp.where(dist == minv, iota_gn, n_i32)
        idx = jnp.min(cand, axis=2, keepdims=True)        # (Bt,G,1) argmin
        onehot = iota_gn == idx                           # (Bt,G,N) exactly-1
        # Gather the k-th nearest neighbor of every group: lane-dense (3, G)
        # result per batch row via a deep-N MXU contraction.
        pts = jnp.einsum('bcn,bgn->bcg', xyz3, onehot.astype(jnp.float32),
                         preferred_element_type=jnp.float32)   # (Bt,3,G)
        if k == 0:
            ctr3g = pts        # nearest neighbor of a center is the center
        nbr_ref[:, 3 * k:3 * (k + 1), :] = (pts - ctr3g).astype(nbr_ref.dtype)
        if k + 1 < k_total:
            dist = jnp.where(onehot, big, dist)           # mask selected point

    ctr_ref[...] = ctr3g.astype(ctr_ref.dtype)


# ----------------------------------------------------------------------------
# Wrapper == Grouper.forward
# ----------------------------------------------------------------------------
@functools.partial(jax.jit,
                   static_argnames=("group_ratio", "group_size", "batch_block"))
def grouper_forward(xyz, *, group_ratio, group_size, batch_block=None):
    """xyz: (B, N, 3) f32. Returns (neighborhood (B,G,K,3), center (B,G,3))."""
    b, n, _ = xyz.shape
    g = int(n * group_ratio)
    k = group_size

    # Batch rows per grid step: gives the serial FPS chain ILP while keeping
    # >= 2 grid steps when possible (so v7x megacore still gets parallel work).
    if batch_block is None:
        batch_block = 1
        for d in (8, 4, 2):
            if b % d == 0 and b // d >= 2:
                batch_block = d
                break
    bt = batch_block
    if b % bt != 0:
        raise ValueError(f"batch_block={bt} must divide batch={b}")

    xyz_3n = jnp.transpose(xyz, (0, 2, 1))                # (B, 3, N)

    # Per-step VMEM footprint estimate (inputs/outputs double-buffered by the
    # BlockSpec pipeline + the (Bt, G, N) distance scratch).  Only raise the
    # scoped limit when the small default would not fit; stay well under
    # v7x's 64 MiB physical VMEM.
    est_vmem = 4 * bt * (2 * 3 * n + g * n + 2 * (3 * k * g) + 2 * (3 * g))
    est_vmem += 1 << 20                                   # headroom
    cp_kwargs = dict(dimension_semantics=("parallel",))
    if est_vmem > (16 << 20):
        cp_kwargs["vmem_limit_bytes"] = min(est_vmem, 48 << 20)

    nbr_ckg, ctr_3g = pl.pallas_call(
        grouper_kernel,
        out_shape=(jax.ShapeDtypeStruct((b, 3 * k, g), jnp.float32),
                   jax.ShapeDtypeStruct((b, 3, g), jnp.float32)),
        grid=(b // bt,),
        in_specs=[pl.BlockSpec((bt, 3, n), lambda i: (i, 0, 0))],
        out_specs=(pl.BlockSpec((bt, 3 * k, g), lambda i: (i, 0, 0)),
                   pl.BlockSpec((bt, 3, g), lambda i: (i, 0, 0))),
        scratch_shapes=[pltpu.VMEM((bt, g, n), jnp.float32)],
        compiler_params=pltpu.CompilerParams(**cp_kwargs),
    )(xyz_3n)

    # Cheap layout plumbing back to the reference (B,G,K,3) / (B,G,3) layout.
    neighborhood = jnp.transpose(nbr_ckg.reshape(b, k, 3, g), (0, 3, 1, 2))
    center = jnp.transpose(ctr_3g, (0, 2, 1))
    return neighborhood, center


# ----------------------------------------------------------------------------
# Pure-JAX reference (same deterministic tie-breaking) for validation.
# ----------------------------------------------------------------------------
def ref_group(xyz, group_ratio, group_size):
    b, n, _ = xyz.shape
    g_total = int(n * group_ratio)

    def one(pts):  # (N, 3)
        def body(g, carry):
            mindist, far, cidx = carry
            cidx = cidx.at[g].set(far)
            d = jnp.sum((pts - pts[far]) ** 2, axis=-1)
            mindist = jnp.minimum(mindist, d)
            far = jnp.argmax(mindist).astype(jnp.int32)
            return mindist, far, cidx

        mindist0 = jnp.full((n,), jnp.finfo(jnp.float32).max, dtype=jnp.float32)
        _, _, cidx = jax.lax.fori_loop(
            0, g_total, body,
            (mindist0, jnp.array(0, jnp.int32),
             jnp.zeros((g_total,), jnp.int32)))
        centers = pts[cidx]                                    # (G, 3)
        dist = jnp.sum((centers[:, None, :] - pts[None, :, :]) ** 2, axis=-1)
        idx = jnp.argsort(dist, axis=-1)[:, :group_size]       # (G, K)
        nbr = pts[idx] - centers[:, None, :]                   # (G, K, 3)
        return nbr, centers

    return jax.vmap(one)(xyz)


if __name__ == "__main__":
    B, N = 2, 64
    group_ratio, group_size = 0.25, 8          # G = 16, K = 8

    key = jax.random.PRNGKey(0)
    xyz = jax.random.normal(key, (B, N, 3), dtype=jnp.float32)

    nbr, ctr = grouper_forward(xyz, group_ratio=group_ratio,
                               group_size=group_size)
    jax.block_until_ready((nbr, ctr))

    nbr_ref, ctr_ref = ref_group(xyz, group_ratio, group_size)
    np.testing.assert_allclose(np.asarray(ctr), np.asarray(ctr_ref),
                               rtol=1e-4, atol=1e-4)
    np.testing.assert_allclose(np.asarray(nbr), np.asarray(nbr_ref),
                               rtol=1e-4, atol=1e-4)

    assert nbr.shape == (B, int(N * group_ratio), group_size, 3)
    assert ctr.shape == (B, int(N * group_ratio), 3)
    print("KERNEL_OK")
</pallas_src>

<mosaic_0001>
module attributes {stable_mosaic.version = 11 : i64} {
  func.func @grouper_kernel(%arg0: i32, %arg1: memref<1x3x64xf32, #tpu.memory_space<vmem>>, %arg2: memref<1x24x16xf32, #tpu.memory_space<vmem>>, %arg3: memref<1x3x16xf32, #tpu.memory_space<vmem>>, %arg4: memref<1x16x64xf32, #tpu.memory_space<vmem>>) attributes {dimension_semantics = [#tpu.dimension_semantics<parallel>], iteration_bounds = array<i64: 2>, scalar_prefetch = 0 : i64, scratch_operands = 1 : i64, tpu.core_type = #tpu.core_type<tc>, window_params = [{transform_indices = @transform_0, window_bounds = array<i64: 1, 3, 64>}, {transform_indices = @transform_1, window_bounds = array<i64: 1, 24, 16>}, {transform_indices = @transform_2, window_bounds = array<i64: 1, 3, 16>}]} {
    %c0 = arith.constant 0 : index
    %c0_0 = arith.constant 0 : index
    %c0_1 = arith.constant 0 : index
    %0 = vector.load %arg1[%c0, %c0_0, %c0_1] : memref<1x3x64xf32, #tpu.memory_space<vmem>>, vector<1x3x64xf32>
    %1 = tpu.iota {dimensions = array<i32: 2>} : vector<1x1x64xi32>
    %cst = arith.constant 3.40282347E+38 : f32
    %2 = vector.broadcast %cst : f32 to vector<1x1x64xf32>
    %c0_i32 = arith.constant 0 : i32
    %3 = vector.broadcast %c0_i32 : i32 to vector<1x1x1xi32>
    %c64_i32 = arith.constant 64 : i32
    %c0_i32_2 = arith.constant 0 : i32
    %c16_i32 = arith.constant 16 : i32
    %4 = arith.addi %c0_i32_2, %c16_i32 : i32
    %c1_i32 = arith.constant 1 : i32
    %5:2 = scf.for %arg5 = %c0_i32_2 to %4 step %c1_i32 iter_args(%arg6 = %2, %arg7 = %3) -> (vector<1x1x64xf32>, vector<1x1x1xi32>)  : i32 {
      %143 = vector.broadcast %arg7 : vector<1x1x1xi32> to vector<1x1x64xi32>
      %144 = arith.cmpi eq, %1, %143 : vector<1x1x64xi32>
      %145 = arith.extui %144 : vector<1x1x64xi1> to vector<1x1x64xi32>
      %146 = arith.sitofp %145 : vector<1x1x64xi32> to vector<1x1x64xf32>
      %147 = vector.broadcast %146 : vector<1x1x64xf32> to vector<1x3x64xf32>
      %148 = arith.mulf %0, %147 : vector<1x3x64xf32>
      %cst_66 = arith.constant dense<0.000000e+00> : vector<1x3xf32>
      %149 = vector.multi_reduction <add>, %148, %cst_66 [2] : vector<1x3x64xf32> to vector<1x3xf32>
      %150 = vector.shape_cast %149 : vector<1x3xf32> to vector<1x3x1xf32>
      %151 = vector.broadcast %150 : vector<1x3x1xf32> to vector<1x3x64xf32>
      %152 = arith.subf %0, %151 : vector<1x3x64xf32>
      %153 = arith.mulf %152, %152 : vector<1x3x64xf32>
      %cst_67 = arith.constant dense<0.000000e+00> : vector<1x64xf32>
      %154 = vector.multi_reduction <add>, %153, %cst_67 [1] : vector<1x3x64xf32> to vector<1x64xf32>
      %155 = vector.shape_cast %154 : vector<1x64xf32> to vector<1x1x64xf32>
      %c0_68 = arith.constant 0 : index
      %156 = arith.index_cast %arg5 : i32 to index
      %c0_69 = arith.constant 0 : index
      %157 = vector.load %arg4[%c0_68, %156, %c0_69] : memref<1x16x64xf32, #tpu.memory_space<vmem>>, vector<1x1x64xf32>
      tpu.vector_store %arg4[%c0_68, %156, %c0_69], %155 {strides = array<i32>} : memref<1x16x64xf32, #tpu.memory_space<vmem>>, vector<1x1x64xf32>,
      %158 = arith.minimumf %arg6, %155 : vector<1x1x64xf32>
      %cst_70 = arith.constant dense<0xFF800000> : vector<1x1xf32>
      %159 = vector.multi_reduction <maximumf>, %158, %cst_70 [2] : vector<1x1x64xf32> to vector<1x1xf32>
      %160 = vector.shape_cast %159 : vector<1x1xf32> to vector<1x1x1xf32>
      %161 = vector.broadcast %160 : vector<1x1x1xf32> to vector<1x1x64xf32>
      %162 = arith.cmpf oeq, %158, %161 : vector<1x1x64xf32>
      %163 = vector.broadcast %c64_i32 : i32 to vector<1x1x64xi32>
      %164 = arith.select %162, %1, %163 : vector<1x1x64xi1>, vector<1x1x64xi32>
      %cst_71 = arith.constant dense<2147483647> : vector<1x1xi32>
      %165 = vector.multi_reduction <minsi>, %164, %cst_71 [2] : vector<1x1x64xi32> to vector<1x1xi32>
      %166 = vector.shape_cast %165 : vector<1x1xi32> to vector<1x1x1xi32>
      scf.yield %158, %166 : vector<1x1x64xf32>, vector<1x1x1xi32>
    }
    %c16_i32_3 = arith.constant 16 : i32
    %c0_4 = arith.constant 0 : index
    %c0_5 = arith.constant 0 : index
    %c0_6 = arith.constant 0 : index
    %6 = vector.load %arg4[%c0_4, %c0_5, %c0_6] : memref<1x16x64xf32, #tpu.memory_space<vmem>>, vector<1x16x64xf32>
    %7 = tpu.iota {dimensions = array<i32: 2>} : vector<1x16x64xi32>
    %cst_7 = arith.constant dense<0x7F800000> : vector<1x16xf32>
    %8 = vector.multi_reduction <minimumf>, %6, %cst_7 [2] : vector<1x16x64xf32> to vector<1x16xf32>
    %9 = vector.shape_cast %8 : vector<1x16xf32> to vector<1x16x1xf32>
    %10 = vector.broadcast %9 : vector<1x16x1xf32> to vector<1x16x64xf32>
    %11 = arith.cmpf oeq, %6, %10 : vector<1x16x64xf32>
    %c64_i32_8 = arith.constant 64 : i32
    %12 = vector.broadcast %c64_i32_8 : i32 to vector<1x16x64xi32>
    %13 = arith.select %11, %7, %12 : vector<1x16x64xi1>, vector<1x16x64xi32>
    %cst_9 = arith.constant dense<2147483647> : vector<1x16xi32>
    %14 = vector.multi_reduction <minsi>, %13, %cst_9 [2] : vector<1x16x64xi32> to vector<1x16xi32>
    %15 = vector.shape_cast %14 : vector<1x16xi32> to vector<1x16x1xi32>
    %16 = vector.broadcast %15 : vector<1x16x1xi32> to vector<1x16x64xi32>
    %17 = arith.cmpi eq, %7, %16 : vector<1x16x64xi32>
    %18 = arith.extui %17 : vector<1x16x64xi1> to vector<1x16x64xi32>
    %19 = arith.sitofp %18 : vector<1x16x64xi32> to vector<1x16x64xf32>
    "tpu.trace_start"() <{level = 10 : i32, message = "bcn,bgn->bcg"}> : () -> ()
    %cst_10 = arith.constant dense<0.000000e+00> : vector<1x3x16xf32>
    %20 = tpu.matmul %0, %19, %cst_10 {dimension_numbers = #tpu.dot_dimension_numbers<[2], [2], [1], [1], [0, 0, 0, 1, 1, 1], [0], [0]>} : vector<1x3x64xf32>, vector<1x16x64xf32>, vector<1x3x16xf32> -> vector<1x3x16xf32>
    "tpu.trace_stop"() : () -> ()
    %21 = arith.subf %20, %20 : vector<1x3x16xf32>
    %c0_11 = arith.constant 0 : index
    %c0_12 = arith.constant 0 : index
    %c0_13 = arith.constant 0 : index
    %22 = vector.load %arg2[%c0_11, %c0_12, %c0_13] : memref<1x24x16xf32, #tpu.memory_space<vmem>>, vector<1x3x16xf32>
    tpu.vector_store %arg2[%c0_11, %c0_12, %c0_13], %21 {strides = array<i32>} : memref<1x24x16xf32, #tpu.memory_space<vmem>>, vector<1x3x16xf32>,
    %cst_14 = arith.constant 3.40282347E+38 : f32
    %23 = vector.broadcast %cst_14 : f32 to vector<1x16x64xf32>
    %24 = arith.select %17, %23, %6 : vector<1x16x64xi1>, vector<1x16x64xf32>
    %cst_15 = arith.constant dense<0x7F800000> : vector<1x16xf32>
    %25 = vector.multi_reduction <minimumf>, %24, %cst_15 [2] : vector<1x16x64xf32> to vector<1x16xf32>
    %26 = vector.shape_cast %25 : vector<1x16xf32> to vector<1x16x1xf32>
    %27 = vector.broadcast %26 : vector<1x16x1xf32> to vector<1x16x64xf32>
    %28 = arith.cmpf oeq, %24, %27 : vector<1x16x64xf32>
    %c64_i32_16 = arith.constant 64 : i32
    %29 = vector.broadcast %c64_i32_16 : i32 to vector<1x16x64xi32>
    %30 = arith.select %28, %7, %29 : vector<1x16x64xi1>, vector<1x16x64xi32>
    %cst_17 = arith.constant dense<2147483647> : vector<1x16xi32>
    %31 = vector.multi_reduction <minsi>, %30, %cst_17 [2] : vector<1x16x64xi32> to vector<1x16xi32>
    %32 = vector.shape_cast %31 : vector<1x16xi32> to vector<1x16x1xi32>
    %33 = vector.broadcast %32 : vector<1x16x1xi32> to vector<1x16x64xi32>
    %34 = arith.cmpi eq, %7, %33 : vector<1x16x64xi32>
    %35 = arith.extui %34 : vector<1x16x64xi1> to vector<1x16x64xi32>
    %36 = arith.sitofp %35 : vector<1x16x64xi32> to vector<1x16x64xf32>
    "tpu.trace_start"() <{level = 10 : i32, message = "bcn,bgn->bcg"}> : () -> ()
    %cst_18 = arith.constant dense<0.000000e+00> : vector<1x3x16xf32>
    %37 = tpu.matmul %0, %36, %cst_18 {dimension_numbers = #tpu.dot_dimension_numbers<[2], [2], [1], [1], [0, 0, 0, 1, 1, 1], [0], [0]>} : vector<1x3x64xf32>, vector<1x16x64xf32>, vector<1x3x16xf32> -> vector<1x3x16xf32>
    "tpu.trace_stop"() : () -> ()
    %38 = arith.subf %37, %20 : vector<1x3x16xf32>
    %c0_19 = arith.constant 0 : index
    %c3 = arith.constant 3 : index
    %c0_20 = arith.constant 0 : index
    %39 = vector.load %arg2[%c0_19, %c3, %c0_20] : memref<1x24x16xf32, #tpu.memory_space<vmem>>, vector<1x3x16xf32>
    tpu.vector_store %arg2[%c0_19, %c3, %c0_20], %38 {strides = array<i32>} : memref<1x24x16xf32, #tpu.memory_space<vmem>>, vector<1x3x16xf32>,
    %cst_21 = arith.constant 3.40282347E+38 : f32
    %40 = vector.broadcast %cst_21 : f32 to vector<1x16x64xf32>
    %41 = arith.select %34, %40, %24 : vector<1x16x64xi1>, vector<1x16x64xf32>
    %cst_22 = arith.constant dense<0x7F800000> : vector<1x16xf32>
    %42 = vector.multi_reduction <minimumf>, %41, %cst_22 [2] : vector<1x16x64xf32> to vector<1x16xf32>
    %43 = vector.shape_cast %42 : vector<1x16xf32> to vector<1x16x1xf32>
    %44 = vector.broadcast %43 : vector<1x16x1xf32> to vector<1x16x64xf32>
    %45 = arith.cmpf oeq, %41, %44 : vector<1x16x64xf32>
    %c64_i32_23 = arith.constant 64 : i32
    %46 = vector.broadcast %c64_i32_23 : i32 to vector<1x16x64xi32>
    %47 = arith.select %45, %7, %46 : vector<1x16x64xi1>, vector<1x16x64xi32>
    %cst_24 = arith.constant dense<2147483647> : vector<1x16xi32>
    %48 = vector.multi_reduction <minsi>, %47, %cst_24 [2] : vector<1x16x64xi32> to vector<1x16xi32>
    %49 = vector.shape_cast %48 : vector<1x16xi32> to vector<1x16x1xi32>
    %50 = vector.broadcast %49 : vector<1x16x1xi32> to vector<1x16x64xi32>
    %51 = arith.cmpi eq, %7, %50 : vector<1x16x64xi32>
    %52 = arith.extui %51 : vector<1x16x64xi1> to vector<1x16x64xi32>
    %53 = arith.sitofp %52 : vector<1x16x64xi32> to vector<1x16x64xf32>
    "tpu.trace_start"() <{level = 10 : i32, message = "bcn,bgn->bcg"}> : () -> ()
    %cst_25 = arith.constant dense<0.000000e+00> : vector<1x3x16xf32>
    %54 = tpu.matmul %0, %53, %cst_25 {dimension_numbers = #tpu.dot_dimension_numbers<[2], [2], [1], [1], [0, 0, 0, 1, 1, 1], [0], [0]>} : vector<1x3x64xf32>, vector<1x16x64xf32>, vector<1x3x16xf32> -> vector<1x3x16xf32>
    "tpu.trace_stop"() : () -> ()
    %55 = arith.subf %54, %20 : vector<1x3x16xf32>
    %c0_26 = arith.constant 0 : index
    %c6 = arith.constant 6 : index
    %c0_27 = arith.constant 0 : index
    %56 = vector.load %arg2[%c0_26, %c6, %c0_27] : memref<1x24x16xf32, #tpu.memory_space<vmem>>, vector<1x3x16xf32>
    tpu.vector_store %arg2[%c0_26, %c6, %c0_27], %55 {strides = array<i32>} : memref<1x24x16xf32, #tpu.memory_space<vmem>>, vector<1x3x16xf32>,
    %cst_28 = arith.constant 3.40282347E+38 : f32
    %57 = vector.broadcast %cst_28 : f32 to vector<1x16x64xf32>
    %58 = arith.select %51, %57, %41 : vector<1x16x64xi1>, vector<1x16x64xf32>
    %cst_29 = arith.constant dense<0x7F800000> : vector<1x16xf32>
    %59 = vector.multi_reduction <minimumf>, %58, %cst_29 [2] : vector<1x16x64xf32> to vector<1x16xf32>
    %60 = vector.shape_cast %59 : vector<1x16xf32> to vector<1x16x1xf32>
    %61 = vector.broadcast %60 : vector<1x16x1xf32> to vector<1x16x64xf32>
    %62 = arith.cmpf oeq, %58, %61 : vector<1x16x64xf32>
    %c64_i32_30 = arith.constant 64 : i32
    %63 = vector.broadcast %c64_i32_30 : i32 to vector<1x16x64xi32>
    %64 = arith.select %62, %7, %63 : vector<1x16x64xi1>, vector<1x16x64xi32>
    %cst_31 = arith.constant dense<2147483647> : vector<1x16xi32>
    %65 = vector.multi_reduction <minsi>, %64, %cst_31 [2] : vector<1x16x64xi32> to vector<1x16xi32>
    %66 = vector.shape_cast %65 : vector<1x16xi32> to vector<1x16x1xi32>
    %67 = vector.broadcast %66 : vector<1x16x1xi32> to vector<1x16x64xi32>
    %68 = arith.cmpi eq, %7, %67 : vector<1x16x64xi32>
    %69 = arith.extui %68 : vector<1x16x64xi1> to vector<1x16x64xi32>
    %70 = arith.sitofp %69 : vector<1x16x64xi32> to vector<1x16x64xf32>
    "tpu.trace_start"() <{level = 10 : i32, message = "bcn,bgn->bcg"}> : () -> ()
    %cst_32 = arith.constant dense<0.000000e+00> : vector<1x3x16xf32>
    %71 = tpu.matmul %0, %70, %cst_32 {dimension_numbers = #tpu.dot_dimension_numbers<[2], [2], [1], [1], [0, 0, 0, 1, 1, 1], [0], [0]>} : vector<1x3x64xf32>, vector<1x16x64xf32>, vector<1x3x16xf32> -> vector<1x3x16xf32>
    "tpu.trace_stop"() : () -> ()
    %72 = arith.subf %71, %20 : vector<1x3x16xf32>
    %c0_33 = arith.constant 0 : index
    %c9 = arith.constant 9 : index
    %c0_34 = arith.constant 0 : index
    %73 = vector.load %arg2[%c0_33, %c9, %c0_34] : memref<1x24x16xf32, #tpu.memory_space<vmem>>, vector<1x3x16xf32>
    tpu.vector_store %arg2[%c0_33, %c9, %c0_34], %72 {strides = array<i32>} : memref<1x24x16xf32, #tpu.memory_space<vmem>>, vector<1x3x16xf32>,
    %cst_35 = arith.constant 3.40282347E+38 : f32
    %74 = vector.broadcast %cst_35 : f32 to vector<1x16x64xf32>
    %75 = arith.select %68, %74, %58 : vector<1x16x64xi1>, vector<1x16x64xf32>
    %cst_36 = arith.constant dense<0x7F800000> : vector<1x16xf32>
    %76 = vector.multi_reduction <minimumf>, %75, %cst_36 [2] : vector<1x16x64xf32> to vector<1x16xf32>
    %77 = vector.shape_cast %76 : vector<1x16xf32> to vector<1x16x1xf32>
    %78 = vector.broadcast %77 : vector<1x16x1xf32> to vector<1x16x64xf32>
    %79 = arith.cmpf oeq, %75, %78 : vector<1x16x64xf32>
    %c64_i32_37 = arith.constant 64 : i32
    %80 = vector.broadcast %c64_i32_37 : i32 to vector<1x16x64xi32>
    %81 = arith.select %79, %7, %80 : vector<1x16x64xi1>, vector<1x16x64xi32>
    %cst_38 = arith.constant dense<2147483647> : vector<1x16xi32>
    %82 = vector.multi_reduction <minsi>, %81, %cst_38 [2] : vector<1x16x64xi32> to vector<1x16xi32>
    %83 = vector.shape_cast %82 : vector<1x16xi32> to vector<1x16x1xi32>
    %84 = vector.broadcast %83 : vector<1x16x1xi32> to vector<1x16x64xi32>
    %85 = arith.cmpi eq, %7, %84 : vector<1x16x64xi32>
    %86 = arith.extui %85 : vector<1x16x64xi1> to vector<1x16x64xi32>
    %87 = arith.sitofp %86 : vector<1x16x64xi32> to vector<1x16x64xf32>
    "tpu.trace_start"() <{level = 10 : i32, message = "bcn,bgn->bcg"}> : () -> ()
    %cst_39 = arith.constant dense<0.000000e+00> : vector<1x3x16xf32>
    %88 = tpu.matmul %0, %87, %cst_39 {dimension_numbers = #tpu.dot_dimension_numbers<[2], [2], [1], [1], [0, 0, 0, 1, 1, 1], [0], [0]>} : vector<1x3x64xf32>, vector<1x16x64xf32>, vector<1x3x16xf32> -> vector<1x3x16xf32>
    "tpu.trace_stop"() : () -> ()
    %89 = arith.subf %88, %20 : vector<1x3x16xf32>
    %c0_40 = arith.constant 0 : index
    %c12 = arith.constant 12 : index
    %c0_41 = arith.constant 0 : index
    %90 = vector.load %arg2[%c0_40, %c12, %c0_41] : memref<1x24x16xf32, #tpu.memory_space<vmem>>, vector<1x3x16xf32>
    tpu.vector_store %arg2[%c0_40, %c12, %c0_41], %89 {strides = array<i32>} : memref<1x24x16xf32, #tpu.memory_space<vmem>>, vector<1x3x16xf32>,
    %cst_42 = arith.constant 3.40282347E+38 : f32
    %91 = vector.broadcast %cst_42 : f32 to vector<1x16x64xf32>
    %92 = arith.select %85, %91, %75 : vector<1x16x64xi1>, vector<1x16x64xf32>
    %cst_43 = arith.constant dense<0x7F800000> : vector<1x16xf32>
    %93 = vector.multi_reduction <minimumf>, %92, %cst_43 [2] : vector<1x16x64xf32> to vector<1x16xf32>
    %94 = vector.shape_cast %93 : vector<1x16xf32> to vector<1x16x1xf32>
    %95 = vector.broadcast %94 : vector<1x16x1xf32> to vector<1x16x64xf32>
    %96 = arith.cmpf oeq, %92, %95 : vector<1x16x64xf32>
    %c64_i32_44 = arith.constant 64 : i32
    %97 = vector.broadcast %c64_i32_44 : i32 to vector<1x16x64xi32>
    %98 = arith.select %96, %7, %97 : vector<1x16x64xi1>, vector<1x16x64xi32>
    %cst_45 = arith.constant dense<2147483647> : vector<1x16xi32>
    %99 = vector.multi_reduction <minsi>, %98, %cst_45 [2] : vector<1x16x64xi32> to vector<1x16xi32>
    %100 = vector.shape_cast %99 : vector<1x16xi32> to vector<1x16x1xi32>
    %101 = vector.broadcast %100 : vector<1x16x1xi32> to vector<1x16x64xi32>
    %102 = arith.cmpi eq, %7, %101 : vector<1x16x64xi32>
    %103 = arith.extui %102 : vector<1x16x64xi1> to vector<1x16x64xi32>
    %104 = arith.sitofp %103 : vector<1x16x64xi32> to vector<1x16x64xf32>
    "tpu.trace_start"() <{level = 10 : i32, message = "bcn,bgn->bcg"}> : () -> ()
    %cst_46 = arith.constant dense<0.000000e+00> : vector<1x3x16xf32>
    %105 = tpu.matmul %0, %104, %cst_46 {dimension_numbers = #tpu.dot_dimension_numbers<[2], [2], [1], [1], [0, 0, 0, 1, 1, 1], [0], [0]>} : vector<1x3x64xf32>, vector<1x16x64xf32>, vector<1x3x16xf32> -> vector<1x3x16xf32>
    "tpu.trace_stop"() : () -> ()
    %106 = arith.subf %105, %20 : vector<1x3x16xf32>
    %c0_47 = arith.constant 0 : index
    %c15 = arith.constant 15 : index
    %c0_48 = arith.constant 0 : index
    %107 = vector.load %arg2[%c0_47, %c15, %c0_48] : memref<1x24x16xf32, #tpu.memory_space<vmem>>, vector<1x3x16xf32>
    tpu.vector_store %arg2[%c0_47, %c15, %c0_48], %106 {strides = array<i32>} : memref<1x24x16xf32, #tpu.memory_space<vmem>>, vector<1x3x16xf32>,
    %cst_49 = arith.constant 3.40282347E+38 : f32
    %108 = vector.broadcast %cst_49 : f32 to vector<1x16x64xf32>
    %109 = arith.select %102, %108, %92 : vector<1x16x64xi1>, vector<1x16x64xf32>
    %cst_50 = arith.constant dense<0x7F800000> : vector<1x16xf32>
    %110 = vector.multi_reduction <minimumf>, %109, %cst_50 [2] : vector<1x16x64xf32> to vector<1x16xf32>
    %111 = vector.shape_cast %110 : vector<1x16xf32> to vector<1x16x1xf32>
    %112 = vector.broadcast %111 : vector<1x16x1xf32> to vector<1x16x64xf32>
    %113 = arith.cmpf oeq, %109, %112 : vector<1x16x64xf32>
    %c64_i32_51 = arith.constant 64 : i32
    %114 = vector.broadcast %c64_i32_51 : i32 to vector<1x16x64xi32>
    %115 = arith.select %113, %7, %114 : vector<1x16x64xi1>, vector<1x16x64xi32>
    %cst_52 = arith.constant dense<2147483647> : vector<1x16xi32>
    %116 = vector.multi_reduction <minsi>, %115, %cst_52 [2] : vector<1x16x64xi32> to vector<1x16xi32>
    %117 = vector.shape_cast %116 : vector<1x16xi32> to vector<1x16x1xi32>
    %118 = vector.broadcast %117 : vector<1x16x1xi32> to vector<1x16x64xi32>
    %119 = arith.cmpi eq, %7, %118 : vector<1x16x64xi32>
    %120 = arith.extui %119 : vector<1x16x64xi1> to vector<1x16x64xi32>
    %121 = arith.sitofp %120 : vector<1x16x64xi32> to vector<1x16x64xf32>
    "tpu.trace_start"() <{level = 10 : i32, message = "bcn,bgn->bcg"}> : () -> ()
    %cst_53 = arith.constant dense<0.000000e+00> : vector<1x3x16xf32>
    %122 = tpu.matmul %0, %121, %cst_53 {dimension_numbers = #tpu.dot_dimension_numbers<[2], [2], [1], [1], [0, 0, 0, 1, 1, 1], [0], [0]>} : vector<1x3x64xf32>, vector<1x16x64xf32>, vector<1x3x16xf32> -> vector<1x3x16xf32>
    "tpu.trace_stop"() : () -> ()
    %123 = arith.subf %122, %20 : vector<1x3x16xf32>
    %c0_54 = arith.constant 0 : index
    %c18 = arith.constant 18 : index
    %c0_55 = arith.constant 0 : index
    %124 = vector.load %arg2[%c0_54, %c18, %c0_55] : memref<1x24x16xf32, #tpu.memory_space<vmem>>, vector<1x3x16xf32>
    tpu.vector_store %arg2[%c0_54, %c18, %c0_55], %123 {strides = array<i32>} : memref<1x24x16xf32, #tpu.memory_space<vmem>>, vector<1x3x16xf32>,
    %cst_56 = arith.constant 3.40282347E+38 : f32
    %125 = vector.broadcast %cst_56 : f32 to vector<1x16x64xf32>
    %126 = arith.select %119, %125, %109 : vector<1x16x64xi1>, vector<1x16x64xf32>
    %cst_57 = arith.constant dense<0x7F800000> : vector<1x16xf32>
    %127 = vector.multi_reduction <minimumf>, %126, %cst_57 [2] : vector<1x16x64xf32> to vector<1x16xf32>
    %128 = vector.shape_cast %127 : vector<1x16xf32> to vector<1x16x1xf32>
    %129 = vector.broadcast %128 : vector<1x16x1xf32> to vector<1x16x64xf32>
    %130 = arith.cmpf oeq, %126, %129 : vector<1x16x64xf32>
    %c64_i32_58 = arith.constant 64 : i32
    %131 = vector.broadcast %c64_i32_58 : i32 to vector<1x16x64xi32>
    %132 = arith.select %130, %7, %131 : vector<1x16x64xi1>, vector<1x16x64xi32>
    %cst_59 = arith.constant dense<2147483647> : vector<1x16xi32>
    %133 = vector.multi_reduction <minsi>, %132, %cst_59 [2] : vector<1x16x64xi32> to vector<1x16xi32>
    %134 = vector.shape_cast %133 : vector<1x16xi32> to vector<1x16x1xi32>
    %135 = vector.broadcast %134 : vector<1x16x1xi32> to vector<1x16x64xi32>
    %136 = arith.cmpi eq, %7, %135 : vector<1x16x64xi32>
    %137 = arith.extui %136 : vector<1x16x64xi1> to vector<1x16x64xi32>
    %138 = arith.sitofp %137 : vector<1x16x64xi32> to vector<1x16x64xf32>
    "tpu.trace_start"() <{level = 10 : i32, message = "bcn,bgn->bcg"}> : () -> ()
    %cst_60 = arith.constant dense<0.000000e+00> : vector<1x3x16xf32>
    %139 = tpu.matmul %0, %138, %cst_60 {dimension_numbers = #tpu.dot_dimension_numbers<[2], [2], [1], [1], [0, 0, 0, 1, 1, 1], [0], [0]>} : vector<1x3x64xf32>, vector<1x16x64xf32>, vector<1x3x16xf32> -> vector<1x3x16xf32>
    "tpu.trace_stop"() : () -> ()
    %140 = arith.subf %139, %20 : vector<1x3x16xf32>
    %c0_61 = arith.constant 0 : index
    %c21 = arith.constant 21 : index
    %c0_62 = arith.constant 0 : index
    %141 = vector.load %arg2[%c0_61, %c21, %c0_62] : memref<1x24x16xf32, #tpu.memory_space<vmem>>, vector<1x3x16xf32>
    tpu.vector_store %arg2[%c0_61, %c21, %c0_62], %140 {strides = array<i32>} : memref<1x24x16xf32, #tpu.memory_space<vmem>>, vector<1x3x16xf32>,
    %c0_63 = arith.constant 0 : index
    %c0_64 = arith.constant 0 : index
    %c0_65 = arith.constant 0 : index
    %142 = vector.load %arg3[%c0_63, %c0_64, %c0_65] : memref<1x3x16xf32, #tpu.memory_space<vmem>>, vector<1x3x16xf32>
    tpu.vector_store %arg3[%c0_63, %c0_64, %c0_65], %20 {strides = array<i32>} : memref<1x3x16xf32, #tpu.memory_space<vmem>>, vector<1x3x16xf32>,
    return
  }
  func.func @transform_0(%arg0: i32) -> (i32, i32, i32) {
    %c0_i32 = arith.constant 0 : i32
    %c0_i32_0 = arith.constant 0 : i32
    %c0_i32_1 = arith.constant 0 : i32
    return %arg0, %c0_i32, %c0_i32_0 : i32, i32, i32
  }
  func.func @transform_1(%arg0: i32) -> (i32, i32, i32) {
    %c0_i32 = arith.constant 0 : i32
    %c0_i32_0 = arith.constant 0 : i32
    %c0_i32_1 = arith.constant 0 : i32
    return %arg0, %c0_i32, %c0_i32_0 : i32, i32, i32
  }
  func.func @transform_2(%arg0: i32) -> (i32, i32, i32) {
    %c0_i32 = arith.constant 0 : i32
    %c0_i32_0 = arith.constant 0 : i32
    %c0_i32_1 = arith.constant 0 : i32
    return %arg0, %c0_i32, %c0_i32_0 : i32, i32, i32
  }
}

</mosaic_0001>

<bundles_post_ra>
// kernel: grouper_forward.1
= control target key start
LH: loop header
LB: loop body
LE: loop exit
PB: predicated region body
PF: predicated region fallthrough
CT: control target
= control target key end

     0   :  { %s1052_s9 = smov 0   ;;  %s1225_s0 = inlined_call_operand.vmem [shape: f32[2,3,64], index: 0, kind: input, shape index: {}]   ;;  %s1226_s1 = inlined_call_operand.vmem [shape: f32[2,24,16], index: 1, kind: output, shape index: {0}]   ;;  %s1227_s2 = inlined_call_operand.vmem [shape: f32[2,3,16], index: 2, kind: output, shape index: {1}]  }
   0x1 LB: > { %s917_s10 = sadd.s32 4294967295, %s1021_s9   ;;  %p921_p0 = scmp.ge.s32.totalorder %s1021_s9, 1  ;;  %s1021_s9 = sphi %s1052_s9, %s13_s9  }
   0x2   : > { %p114_p1 = scmp.lt.s32.totalorder %s1021_s9, 3 }
   0x4   : > { %p115_p2 = pnand %p921_p0, %p114_p1 }
   0x5   : > { %p139_p3 = scmp.lt.s32.totalorder (!%p115_p2), %s917_s10, 1  ;;  %s1077_s22 = smov (!%p115_p2), 0  }
   0x6   : > { %118 = sbr.rel (%p115_p2) target bundleno = 3339 (0xd0b), region = 24 }
   0xb   : > { %v153_v0 = vlaneseq  ;;  %s1229_s10 = smov (!%p139_p3, %s917_s10), 1  ;;  %v1023_v3 = vmov 0   ;;  %v1027_v4 = vmov 3.4028235e+38  }
   0xc   : > { %s922_s11 = sshll.u32 %s1229_s10, 2  ;;  %s968_s12 = smul.u32 24, %s1229_s10 }
   0xd   : > { %v1060_v1 = vand.u32 127, %v153_v0  ;;  %s142_s15 = scalar_lea.vmem %s1225_s0, %s922_s11  ;;  %s1068_s18 = scalar_lea.vmem %s1227_s2, %s922_s11 }
   0xe   : > { %s1073_s21 = scalar_lea.vmem %s1226_s1, %s968_s12  ;;  %v1075_v2 = vld [vmem:[%s142_s15] sm:$0x7] }
   0xf LB: >> { %vm163_vm0 = vcmp.eq.s32.totalorder %v1060_v1, %v1025_v3  ;;  %v1035_v5 = vmov 0.0   ;;  %vm167_vm1 = vcmask 518144   ;;  %vm181_vm2 = vcmask 516096   ;;  %s180_s23 = scalar_lea.vmem [#allocation2], %s1033_s22  ;;  %s160_s22 = sadd.s32 1, %s1033_s22   ;;  %s1033_s22 = sphi %s1077_s22, %s160_s22   ;;  %v1029_v4 = vphi %v1027_v4, %v183_v4   ;;  %v1025_v3 = vphi %v1023_v3, %v204_v3  }
  0x10   : >> { %v925_v6 = vsel %vm163_vm0, 1.0, %v1035_v5  ;;  %vm184_vm3 = vcmask 523264   ;;  %p157_p4 = scmp.ge.s32.totalorder %s160_s22, 16  }
  0x11   : >> { %v166_v7 = vmul.f32 %v925_v6, %v1075_v2  ;;  %v1036_v61 = vmov (%p157_p4), 0.0  }
  0x13   : >> { %v168_v8 = vsel %vm167_vm1, %v166_v7, 0.0 }
  0x14   : >> { %169 = vadd.xlane.f32.xlu0 %v168_v8 }
  0x87   : >> { %v170_v9 = vpop.xlane.xlu0 %169 }
  0x88   : >> { %v171_v10 = vsub.f32 %v1075_v2, %v170_v9 }
  0x8a   : >> { %v172_v11 = vmul.f32 %v171_v10, %v171_v10 }
  0x8c   : >> { %v173_v12 = vsel %vm167_vm1, %v172_v11, 0.0 }
  0x8d   : >> { %v174_v13 = vrot.slane %v173_v12, 4 }
  0x8f   : >> { %v175_v14 = vadd.f32 %v174_v13, %v173_v12 }
  0x91   : >> { %v176_v15 = vrot.slane %v175_v14, 2 }
  0x93   : >> { %v177_v16 = vadd.f32 %v176_v15, %v175_v14 }
  0x95   : >> { %v178_v17 = vrot.slane %v177_v16, 1 }
  0x97   : >> { %v179_v18 = vadd.f32 %v178_v17, %v177_v16 }
  0x99   : >> { %v183_v4 = vmin.f32 %v1029_v4, %v179_v18   ;;  %182 = vst.msk [vmem:[%s180_s23] sm:$0x1] %vm181_vm2, %v179_v18 }
  0x9b   : >> { %v185_v19 = vsel %vm184_vm3, %v183_v4, -inf }
  0x9c   : >> { %186 = vmax.xlane.f32.xlu0 %v185_v19 }
  0xa0   : > { %v206_v33 = vld [vmem:[#allocation2 + $0x8] sm:$0xff] (%p157_p4)  ;;  %v205_v35 = vld [vmem:[#allocation2] sm:$0xff] (%p157_p4) }
  0xa1   : > { %v211_v34 = vsel (%p157_p4), %vm184_vm3, %v206_v33, inf  ;;  %v208_v36 = vsel (%p157_p4), %vm184_vm3, %v205_v35, inf }
  0xa4   : > { %212 = vmin.xlane.f32.xlu0 (%p157_p4), %v211_v34 }
  0xac   : > { %209 = vmin.xlane.f32.xlu0 (%p157_p4), %v208_v36 }
 0x10f   : >> { %v187_v20 = vpop.xlane.xlu0 %186 }
 0x110   : >> { %vm188_vm4 = vcmp.eq.f32.partialorder %v183_v4, %v187_v20 }
 0x111   : >> { %v189_v21 = vsel %vm188_vm4, %v1060_v1, 64 }
 0x112   : >> { %v190_v22 = vsel %vm184_vm3, %v189_v21, 2147483647 }
 0x113   : >> { %v192_v23 = vshra.s32 %v190_v22, 16  ;;  %v191_v25 = vand.u32 65535, %v190_v22 }
 0x115   : >> { %v194_v24 = vcvt.s32.f32 %v192_v23  ;;  %v193_v27 = vcvt.s32.f32 %v191_v25 }
 0x117   : >> { %195 = vmin.xlane.f32.xlu1 %v194_v24  ;;  %v213_v37 = vpop.xlane.xlu0 (%p157_p4), %212 }
 0x118   : > { %vm215_vm6 = vcmp.eq.f32.partialorder (%p157_p4), %v206_v33, %v213_v37 }
 0x119   : > { %v217_v38 = vsel (%p157_p4), %vm215_vm6, %v1060_v1, 64 }
 0x11a   : > { %v233_v39 = vsel (%p157_p4), %vm184_vm3, %v217_v38, 2147483647 }
 0x11b   : > { %v235_v40 = vshra.s32 (%p157_p4), %v233_v39, 16  ;;  %v234_v47 = vand.u32 (%p157_p4), 65535, %v233_v39 }
 0x11d   : > { %v237_v41 = vcvt.s32.f32 (%p157_p4), %v235_v40  ;;  %v236_v49 = vcvt.s32.f32 (%p157_p4), %v234_v47 }
 0x11f   : > { %v210_v42 = vpop.xlane.xlu0 (%p157_p4), %209 }
 0x120   : > { %vm214_vm7 = vcmp.eq.f32.partialorder (%p157_p4), %v205_v35, %v210_v42 }
 0x121   : > { %v216_v43 = vsel (%p157_p4), %vm214_vm7, %v1060_v1, 64 }
 0x122   : > { %v218_v44 = vsel (%p157_p4), %vm184_vm3, %v216_v43, 2147483647 }
 0x123   : > { %v220_v45 = vshra.s32 (%p157_p4), %v218_v44, 16  ;;  %v219_v51 = vand.u32 (%p157_p4), 65535, %v218_v44 }
 0x125   : > { %v222_v46 = vcvt.s32.f32 (%p157_p4), %v220_v45  ;;  %v221_v53 = vcvt.s32.f32 (%p157_p4), %v219_v51 }
 0x18a   : >> { %v196_v26 = vpop.xlane.xlu1 %195 }
 0x18b   : >> { %vm197_vm5 = vcmp.eq.f32.partialorder %v194_v24, %v196_v26  ;;  %v202_v29 = vcvt.f32.s32 %v196_v26 }
 0x18c   : >> { %v198_v28 = vsel %vm197_vm5, %v193_v27, inf }
 0x18d   : >> { %199 = vmin.xlane.f32.xlu1 %v198_v28  ;;  %v203_v31 = vshll.u32 %v202_v29, 16 }
 0x195   : > { %238 = vmin.xlane.f32.xlu1 (%p157_p4), %v237_v41 }
 0x19d   : > { %223 = vmin.xlane.f32.xlu1 (%p157_p4), %v222_v46 }
 0x1ff   : > { %159 = sbr.rel (!%p157_p4) target bundleno = 15 (0xf), region = 74 }
 0x200   : >> { %v200_v30 = vpop.xlane.xlu1 %199 }
 0x201   : >> { %v201_v32 = vcvt.f32.s32 %v200_v30 }
 0x203   : >> { %v204_v3 = vadd.s32 %v203_v31, %v201_v32  }
 0x208   : > { %v239_v48 = vpop.xlane.xlu1 %238 }
 0x209   : > { %vm240_vm8 = vcmp.eq.f32.partialorder %v237_v41, %v239_v48  ;;  %v245_v55 = vcvt.f32.s32 %v239_v48 }
 0x20a   : > { %v241_v50 = vsel %vm240_vm8, %v236_v49, inf }
 0x20b   : > { %242 = vmin.xlane.f32.xlu2 %v241_v50  ;;  %v246_v57 = vshll.u32 %v245_v55, 16 }
 0x210   : > { %v224_v52 = vpop.xlane.xlu1 %223 }
 0x211   : > { %vm225_vm9 = vcmp.eq.f32.partialorder %v222_v46, %v224_v52  ;;  %v230_v60 = vcvt.f32.s32 %v224_v52 }
 0x212   : > { %v226_v54 = vsel %vm225_vm9, %v221_v53, inf }
 0x213   : > { %227 = vmin.xlane.f32.xlu2 %v226_v54  ;;  %v231_v4 = vshll.u32 %v230_v60, 16 }
 0x27e   : > { %v243_v56 = vpop.xlane.xlu2 %242 }
 0x27f   : > { %v244_v58 = vcvt.f32.s32 %v243_v56 }
 0x281   : > { %v247_v59 = vadd.s32 %v246_v57, %v244_v58 }
 0x283   : > { %vm249_vm10 = vcmp.eq.s32.totalorder %v1060_v1, %v247_v59 }
 0x284   : > { %v927_v62 = vsel %vm249_vm10, 1.0, %v1036_v61  ;;  %v287_v63 = vsel %vm249_vm10, 3.4028235e+38, %v206_v33 }
 0x285   : > { %928 = vmatpush.xpose.msk.msra.mxu0 %vm184_vm3, %v927_v62  ;;  %v291_v0 = vsel %vm184_vm3, %v287_v63, inf }
 0x286   : > { %292 = vmin.xlane.f32.xlu0 %v291_v0  ;;  %v228_v3 = vpop.xlane.xlu2 %227 }
 0x287   : > { %v229_v5 = vcvt.f32.s32 %v228_v3 }
 0x289   : > { %v232_v6 = vadd.s32 %v231_v4, %v229_v5 }
 0x28b   : > { %vm248_vm11 = vcmp.eq.s32.totalorder %v1060_v1, %v232_v6 }
 0x28c   : > { %v926_v7 = vsel %vm248_vm11, 1.0, %v1036_v61  ;;  %v286_v8 = vsel %vm248_vm11, 3.4028235e+38, %v205_v35 }
 0x28d   : > { %929 = vmatpush.xpose.msk.msra.mxu0 %vm184_vm3, %v926_v7  ;;  %v288_v9 = vsel %vm184_vm3, %v286_v8, inf }
 0x28e   : > { %289 = vmin.xlane.f32.xlu1 %v288_v9 }
 0x290   : > { %930 = vmatmul.msk.f32.vlgmr.msra.gmra.mxu0 %vm184_vm3, %v1075_v2 }
 0x2f9   : > { %v293_v10 = vpop.xlane.xlu0 %292 }
 0x2fa   : > { %vm295_vm12 = vcmp.eq.f32.partialorder %v287_v63, %v293_v10 }
 0x2fb   : > { %v297_v11 = vsel %vm295_vm12, %v1060_v1, 64 }
 0x2fc   : > { %v313_v12 = vsel %vm184_vm3, %v297_v11, 2147483647 }
 0x2fd   : > { %v315_v13 = vshra.s32 %v313_v12, 16  ;;  %v314_v20 = vand.u32 65535, %v313_v12 }
 0x2ff   : > { %v317_v14 = vcvt.s32.f32 %v315_v13  ;;  %v316_v22 = vcvt.s32.f32 %v314_v20 }
 0x301   : > { %v290_v15 = vpop.xlane.xlu1 %289  ;;  %318 = vmin.xlane.f32.xlu2 %v317_v14 }
 0x302   : > { %vm294_vm13 = vcmp.eq.f32.partialorder %v286_v8, %v290_v15 }
 0x303   : > { %v296_v16 = vsel %vm294_vm13, %v1060_v1, 64 }
 0x304   : > { %v298_v17 = vsel %vm184_vm3, %v296_v16, 2147483647 }
 0x305   : > { %v300_v18 = vshra.s32 %v298_v17, 16  ;;  %v299_v24 = vand.u32 65535, %v298_v17 }
 0x307   : > { %v302_v19 = vcvt.s32.f32 %v300_v18  ;;  %v301_v26 = vcvt.s32.f32 %v299_v24 }
 0x309   : > { %303 = vmin.xlane.f32.xlu0 %v302_v19 }
 0x374   : > { %v319_v21 = vpop.xlane.xlu2 %318 }
 0x375   : > { %vm320_vm14 = vcmp.eq.f32.partialorder %v317_v14, %v319_v21  ;;  %v325_v28 = vcvt.f32.s32 %v319_v21 }
 0x376   : > { %v321_v23 = vsel %vm320_vm14, %v316_v22, inf }
 0x377   : > { %322 = vmin.xlane.f32.xlu1 %v321_v23  ;;  %v326_v30 = vshll.u32 %v325_v28, 16 }
 0x37c   : > { %v304_v25 = vpop.xlane.xlu0 %303 }
 0x37d   : > { %vm305_vm15 = vcmp.eq.f32.partialorder %v302_v19, %v304_v25  ;;  %v310_v33 = vcvt.f32.s32 %v304_v25 }
 0x37e   : > { %v306_v27 = vsel %vm305_vm15, %v301_v26, inf }
 0x37f   : > { %307 = vmin.xlane.f32.xlu2 %v306_v27  ;;  %v311_v38 = vshll.u32 %v310_v33, 16 }
 0x3ea   : > { %v323_v29 = vpop.xlane.xlu1 %322 }
 0x3eb   : > { %v324_v31 = vcvt.f32.s32 %v323_v29 }
 0x3ed   : > { %v327_v32 = vadd.s32 %v326_v30, %v324_v31 }
 0x3ef   : > { %vm329_vm0 = vcmp.eq.s32.totalorder %v1060_v1, %v327_v32 }
 0x3f0   : > { %v932_v34 = vsel %vm329_vm0, 1.0, %v1036_v61  ;;  %v363_v35 = vsel %vm329_vm0, 3.4028235e+38, %v287_v63 }
 0x3f1   : > { %933 = vmatpush.xpose.msk.msra.mxu1 %vm184_vm3, %v932_v34  ;;  %v367_v36 = vsel %vm184_vm3, %v363_v35, inf }
 0x3f2   : > { %368 = vmin.xlane.f32.xlu0 %v367_v36  ;;  %v308_v37 = vpop.xlane.xlu2 %307 }
 0x3f3   : > { %v309_v39 = vcvt.f32.s32 %v308_v37 }
 0x3f5   : > { %v312_v40 = vadd.s32 %v311_v38, %v309_v39 }
 0x3f7   : > { %vm328_vm1 = vcmp.eq.s32.totalorder %v1060_v1, %v312_v40 }
 0x3f8   : > { %v931_v41 = vsel %vm328_vm1, 1.0, %v1036_v61  ;;  %v362_v42 = vsel %vm328_vm1, 3.4028235e+38, %v286_v8 }
 0x3f9   : > { %934 = vmatpush.xpose.msk.msra.mxu1 %vm184_vm3, %v931_v41  ;;  %v364_v43 = vsel %vm184_vm3, %v362_v42, inf }
 0x3fa   : > { %365 = vmin.xlane.f32.xlu1 %v364_v43 }
 0x3fc   : > { %935 = vmatmul.msk.f32.vlgmr.msra.gmra.mxu1 %vm184_vm3, %v1075_v2 }
 0x465   : > { %v369_v44 = vpop.xlane.xlu0 %368 }
 0x466   : > { %vm371_vm2 = vcmp.eq.f32.partialorder %v363_v35, %v369_v44 }
 0x467   : > { %v373_v45 = vsel %vm371_vm2, %v1060_v1, 64 }
 0x468   : > { %v389_v46 = vsel %vm184_vm3, %v373_v45, 2147483647 }
 0x469   : > { %v391_v47 = vshra.s32 %v389_v46, 16  ;;  %v390_v54 = vand.u32 65535, %v389_v46 }
 0x46b   : > { %v393_v48 = vcvt.s32.f32 %v391_v47  ;;  %v392_v56 = vcvt.s32.f32 %v390_v54 }
 0x46d   : > { %v366_v49 = vpop.xlane.xlu1 %365  ;;  %394 = vmin.xlane.f32.xlu2 %v393_v48 }
 0x46e   : > { %vm370_vm4 = vcmp.eq.f32.partialorder %v362_v42, %v366_v49 }
 0x46f   : > { %v372_v50 = vsel %vm370_vm4, %v1060_v1, 64 }
 0x470   : > { %v374_v51 = vsel %vm184_vm3, %v372_v50, 2147483647 }
 0x471   : > { %v376_v52 = vshra.s32 %v374_v51, 16  ;;  %v375_v58 = vand.u32 65535, %v374_v51 }
 0x473   : > { %v378_v53 = vcvt.s32.f32 %v376_v52  ;;  %v377_v60 = vcvt.s32.f32 %v375_v58 }
 0x475   : > { %379 = vmin.xlane.f32.xlu0 %v378_v53 }
 0x4e0   : > { %v395_v55 = vpop.xlane.xlu2 %394 }
 0x4e1   : > { %vm396_vm5 = vcmp.eq.f32.partialorder %v393_v48, %v395_v55  ;;  %v401_v63 = vcvt.f32.s32 %v395_v55 }
 0x4e2   : > { %v397_v57 = vsel %vm396_vm5, %v392_v56, inf }
 0x4e3   : > { %398 = vmin.xlane.f32.xlu1 %v397_v57  ;;  %v402_v3 = vshll.u32 %v401_v63, 16 }
 0x4e8   : > { %v380_v59 = vpop.xlane.xlu0 %379 }
 0x4e9   : > { %vm381_vm6 = vcmp.eq.f32.partialorder %v378_v53, %v380_v59  ;;  %v386_v6 = vcvt.f32.s32 %v380_v59 }
 0x4ea   : > { %v382_v62 = vsel %vm381_vm6, %v377_v60, inf }
 0x4eb   : > { %383 = vmin.xlane.f32.xlu2 %v382_v62  ;;  %v387_v11 = vshll.u32 %v386_v6, 16 }
 0x556   : > { %v399_v0 = vpop.xlane.xlu1 %398 }
 0x557   : > { %v400_v4 = vcvt.f32.s32 %v399_v0 }
 0x559   : > { %v403_v5 = vadd.s32 %v402_v3, %v400_v4 }
 0x55b   : > { %vm405_vm7 = vcmp.eq.s32.totalorder %v1060_v1, %v403_v5 }
 0x55c   : > { %v937_v7 = vsel %vm405_vm7, 1.0, %v1036_v61  ;;  %v439_v8 = vsel %vm405_vm7, 3.4028235e+38, %v363_v35 }
 0x55d   : > { %938 = vmatpush.xpose.msk.msra.mxu2 %vm184_vm3, %v937_v7  ;;  %v443_v9 = vsel %vm184_vm3, %v439_v8, inf }
 0x55e   : > { %444 = vmin.xlane.f32.xlu0 %v443_v9  ;;  %v384_v10 = vpop.xlane.xlu2 %383 }
 0x55f   : > { %v385_v12 = vcvt.f32.s32 %v384_v10 }
 0x561   : > { %v388_v13 = vadd.s32 %v387_v11, %v385_v12 }
 0x563   : > { %vm404_vm8 = vcmp.eq.s32.totalorder %v1060_v1, %v388_v13 }
 0x564   : > { %v936_v14 = vsel %vm404_vm8, 1.0, %v1036_v61  ;;  %v438_v15 = vsel %vm404_vm8, 3.4028235e+38, %v362_v42 }
 0x565   : > { %939 = vmatpush.xpose.msk.msra.mxu2 %vm184_vm3, %v936_v14  ;;  %v440_v16 = vsel %vm184_vm3, %v438_v15, inf }
 0x566   : > { %441 = vmin.xlane.f32.xlu1 %v440_v16 }
 0x568   : > { %940 = vmatmul.msk.f32.vlgmr.msra.gmra.mxu2 %vm184_vm3, %v1075_v2 }
 0x5d1   : > { %v445_v17 = vpop.xlane.xlu0 %444 }
 0x5d2   : > { %vm447_vm9 = vcmp.eq.f32.partialorder %v439_v8, %v445_v17 }
 0x5d3   : > { %v449_v18 = vsel %vm447_vm9, %v1060_v1, 64 }
 0x5d4   : > { %v465_v19 = vsel %vm184_vm3, %v449_v18, 2147483647 }
 0x5d5   : > { %v467_v20 = vshra.s32 %v465_v19, 16  ;;  %v466_v27 = vand.u32 65535, %v465_v19 }
 0x5d7   : > { %v469_v21 = vcvt.s32.f32 %v467_v20  ;;  %v468_v29 = vcvt.s32.f32 %v466_v27 }
 0x5d9   : > { %v442_v22 = vpop.xlane.xlu1 %441  ;;  %470 = vmin.xlane.f32.xlu2 %v469_v21 }
 0x5da   : > { %vm446_vm10 = vcmp.eq.f32.partialorder %v438_v15, %v442_v22 }
 0x5db   : > { %v448_v23 = vsel %vm446_vm10, %v1060_v1, 64 }
 0x5dc   : > { %v450_v24 = vsel %vm184_vm3, %v448_v23, 2147483647 }
 0x5dd   : > { %v452_v25 = vshra.s32 %v450_v24, 16  ;;  %v451_v31 = vand.u32 65535, %v450_v24 }
 0x5df   : > { %v454_v26 = vcvt.s32.f32 %v452_v25  ;;  %v453_v33 = vcvt.s32.f32 %v451_v31 }
 0x5e1   : > { %455 = vmin.xlane.f32.xlu0 %v454_v26 }
 0x64c   : > { %v471_v28 = vpop.xlane.xlu2 %470 }
 0x64d   : > { %vm472_vm11 = vcmp.eq.f32.partialorder %v469_v21, %v471_v28  ;;  %v477_v35 = vcvt.f32.s32 %v471_v28 }
 0x64e   : > { %v473_v30 = vsel %vm472_vm11, %v468_v29, inf }
 0x64f   : > { %474 = vmin.xlane.f32.xlu1 %v473_v30  ;;  %v478_v37 = vshll.u32 %v477_v35, 16 }
 0x654   : > { %v456_v32 = vpop.xlane.xlu0 %455 }
 0x655   : > { %vm457_vm12 = vcmp.eq.f32.partialorder %v454_v26, %v456_v32  ;;  %v462_v40 = vcvt.f32.s32 %v456_v32 }
 0x656   : > { %v458_v34 = vsel %vm457_vm12, %v453_v33, inf }
 0x657   : > { %459 = vmin.xlane.f32.xlu2 %v458_v34  ;;  %v463_v45 = vshll.u32 %v462_v40, 16 }
 0x6c2   : > { %v475_v36 = vpop.xlane.xlu1 %474 }
 0x6c3   : > { %v476_v38 = vcvt.f32.s32 %v475_v36 }
 0x6c5   : > { %v479_v39 = vadd.s32 %v478_v37, %v476_v38 }
 0x6c7   : > { %vm481_vm13 = vcmp.eq.s32.totalorder %v1060_v1, %v479_v39 }
 0x6c8   : > { %v942_v41 = vsel %vm481_vm13, 1.0, %v1036_v61  ;;  %v515_v42 = vsel %vm481_vm13, 3.4028235e+38, %v439_v8 }
 0x6c9   : > { %943 = vmatpush.xpose.msk.msra.mxu3 %vm184_vm3, %v942_v41  ;;  %v519_v43 = vsel %vm184_vm3, %v515_v42, inf }
 0x6ca   : > { %520 = vmin.xlane.f32.xlu0 %v519_v43  ;;  %v460_v44 = vpop.xlane.xlu2 %459 }
 0x6cb   : > { %v461_v46 = vcvt.f32.s32 %v460_v44 }
 0x6cd   : > { %v464_v47 = vadd.s32 %v463_v45, %v461_v46 }
 0x6cf   : > { %vm480_vm14 = vcmp.eq.s32.totalorder %v1060_v1, %v464_v47 }
 0x6d0   : > { %v941_v48 = vsel %vm480_vm14, 1.0, %v1036_v61  ;;  %v514_v49 = vsel %vm480_vm14, 3.4028235e+38, %v438_v15 }
 0x6d1   : > { %944 = vmatpush.xpose.msk.msra.mxu3 %vm184_vm3, %v941_v48  ;;  %v516_v50 = vsel %vm184_vm3, %v514_v49, inf }
 0x6d2   : > { %517 = vmin.xlane.f32.xlu1 %v516_v50 }
 0x6d4   : > { %945 = vmatmul.msk.f32.vlgmr.msra.gmra.mxu3 %vm184_vm3, %v1075_v2 }
 0x73d   : > { %v521_v51 = vpop.xlane.xlu0 %520 }
 0x73e   : > { %vm523_vm15 = vcmp.eq.f32.partialorder %v515_v42, %v521_v51 }
 0x73f   : > { %v525_v52 = vsel %vm523_vm15, %v1060_v1, 64 }
 0x740   : > { %v541_v53 = vsel %vm184_vm3, %v525_v52, 2147483647 }
 0x741   : > { %v543_v54 = vshra.s32 %v541_v53, 16  ;;  %v542_v62 = vand.u32 65535, %v541_v53 }
 0x743   : > { %v545_v55 = vcvt.s32.f32 %v543_v54  ;;  %v544_v0 = vcvt.s32.f32 %v542_v62 }
 0x745   : > { %v518_v56 = vpop.xlane.xlu1 %517  ;;  %546 = vmin.xlane.f32.xlu2 %v545_v55 }
 0x746   : > { %vm522_vm0 = vcmp.eq.f32.partialorder %v514_v49, %v518_v56 }
 0x747   : > { %v524_v57 = vsel %vm522_vm0, %v1060_v1, 64 }
 0x748   : > { %v526_v58 = vsel %vm184_vm3, %v524_v57, 2147483647 }
 0x749   : > { %v528_v59 = vshra.s32 %v526_v58, 16  ;;  %v527_v4 = vand.u32 65535, %v526_v58 }
 0x74b   : > { %v530_v60 = vcvt.s32.f32 %v528_v59  ;;  %v529_v6 = vcvt.s32.f32 %v527_v4 }
 0x74d   : > { %531 = vmin.xlane.f32.xlu0 %v530_v60 }
 0x7b8   : > { %v547_v63 = vpop.xlane.xlu2 %546 }
 0x7b9   : > { %vm548_vm1 = vcmp.eq.f32.partialorder %v545_v55, %v547_v63  ;;  %v553_v8 = vcvt.f32.s32 %v547_v63 }
 0x7ba   : > { %v549_v3 = vsel %vm548_vm1, %v544_v0, inf }
 0x7bb   : > { %550 = vmin.xlane.f32.xlu1 %v549_v3  ;;  %v554_v10 = vshll.u32 %v553_v8, 16 }
 0x7c0   : > { %v532_v5 = vpop.xlane.xlu0 %531 }
 0x7c1   : > { %vm533_vm2 = vcmp.eq.f32.partialorder %v530_v60, %v532_v5  ;;  %v538_v13 = vcvt.f32.s32 %v532_v5 }
 0x7c2   : > { %v534_v7 = vsel %vm533_vm2, %v529_v6, inf }
 0x7c3   : > { %535 = vmin.xlane.f32.xlu2 %v534_v7  ;;  %v539_v18 = vshll.u32 %v538_v13, 16 }
 0x82e   : > { %v551_v9 = vpop.xlane.xlu1 %550 }
 0x82f   : > { %v552_v11 = vcvt.f32.s32 %v551_v9 }
 0x831   : > { %v555_v12 = vadd.s32 %v554_v10, %v552_v11 }
 0x833   : > { %vm557_vm4 = vcmp.eq.s32.totalorder %v1060_v1, %v555_v12 }
 0x834   : > { %v947_v14 = vsel %vm557_vm4, 1.0, %v1036_v61  ;;  %v591_v15 = vsel %vm557_vm4, 3.4028235e+38, %v515_v42 }
 0x835   : > { %948 = vmatpush.xpose.msk.msrb.mxu0 %vm184_vm3, %v947_v14  ;;  %v595_v16 = vsel %vm184_vm3, %v591_v15, inf }
 0x836   : > { %596 = vmin.xlane.f32.xlu0 %v595_v16  ;;  %v536_v17 = vpop.xlane.xlu2 %535 }
 0x837   : > { %v537_v19 = vcvt.f32.s32 %v536_v17 }
 0x839   : > { %v540_v20 = vadd.s32 %v539_v18, %v537_v19 }
 0x83b   : > { %vm556_vm5 = vcmp.eq.s32.totalorder %v1060_v1, %v540_v20 }
 0x83c   : > { %v946_v21 = vsel %vm556_vm5, 1.0, %v1036_v61  ;;  %v590_v22 = vsel %vm556_vm5, 3.4028235e+38, %v514_v49 }
 0x83d   : > { %949 = vmatpush.xpose.msk.msrb.mxu0 %vm184_vm3, %v946_v21  ;;  %v592_v23 = vsel %vm184_vm3, %v590_v22, inf }
 0x83e   : > { %593 = vmin.xlane.f32.xlu1 %v592_v23 }
 0x840   : > { %950 = vmatmul.msk.f32.vlgmr.msrb.gmra.mxu0 %vm184_vm3, %v1075_v2 }
 0x8a9   : > { %v597_v24 = vpop.xlane.xlu0 %596 }
 0x8aa   : > { %vm599_vm6 = vcmp.eq.f32.partialorder %v591_v15, %v597_v24 }
 0x8ab   : > { %v601_v25 = vsel %vm599_vm6, %v1060_v1, 64 }
 0x8ac   : > { %v617_v26 = vsel %vm184_vm3, %v601_v25, 2147483647 }
 0x8ad   : > { %v619_v27 = vshra.s32 %v617_v26, 16  ;;  %v618_v34 = vand.u32 65535, %v617_v26 }
 0x8af   : > { %v621_v28 = vcvt.s32.f32 %v619_v27  ;;  %v620_v36 = vcvt.s32.f32 %v618_v34 }
 0x8b1   : > { %v594_v29 = vpop.xlane.xlu1 %593  ;;  %622 = vmin.xlane.f32.xlu2 %v621_v28 }
 0x8b2   : > { %vm598_vm7 = vcmp.eq.f32.partialorder %v590_v22, %v594_v29 }
 0x8b3   : > { %v600_v30 = vsel %vm598_vm7, %v1060_v1, 64  ;;  %vm284_vm7 = vcmask 124928  }
 0x8b4   : > { %v602_v31 = vsel %vm184_vm3, %v600_v30, 2147483647 }
 0x8b5   : > { %v604_v32 = vshra.s32 %v602_v31, 16  ;;  %v603_v38 = vand.u32 65535, %v602_v31 }
 0x8b7   : > { %v606_v33 = vcvt.s32.f32 %v604_v32  ;;  %v605_v40 = vcvt.s32.f32 %v603_v38 }
 0x8b9   : > { %607 = vmin.xlane.f32.xlu0 %v606_v33 }
 0x924   : > { %v623_v35 = vpop.xlane.xlu2 %622 }
 0x925   : > { %vm624_vm8 = vcmp.eq.f32.partialorder %v621_v28, %v623_v35  ;;  %v629_v42 = vcvt.f32.s32 %v623_v35 }
 0x926   : > { %v625_v37 = vsel %vm624_vm8, %v620_v36, inf }
 0x927   : > { %626 = vmin.xlane.f32.xlu1 %v625_v37  ;;  %v630_v44 = vshll.u32 %v629_v42, 16 }
 0x92c   : > { %v608_v39 = vpop.xlane.xlu0 %607 }
 0x92d   : > { %vm609_vm9 = vcmp.eq.f32.partialorder %v606_v33, %v608_v39  ;;  %v614_v47 = vcvt.f32.s32 %v608_v39 }
 0x92e   : > { %v610_v41 = vsel %vm609_vm9, %v605_v40, inf }
 0x92f   : > { %611 = vmin.xlane.f32.xlu2 %v610_v41  ;;  %v615_v52 = vshll.u32 %v614_v47, 16 }
 0x99a   : > { %v627_v43 = vpop.xlane.xlu1 %626 }
 0x99b   : > { %v628_v45 = vcvt.f32.s32 %v627_v43 }
 0x99d   : > { %v631_v46 = vadd.s32 %v630_v44, %v628_v45 }
 0x99f   : > { %vm633_vm10 = vcmp.eq.s32.totalorder %v1060_v1, %v631_v46 }
 0x9a0   : > { %v952_v48 = vsel %vm633_vm10, 1.0, %v1036_v61  ;;  %v667_v49 = vsel %vm633_vm10, 3.4028235e+38, %v591_v15 }
 0x9a1   : > { %953 = vmatpush.xpose.msk.msrb.mxu1 %vm184_vm3, %v952_v48  ;;  %v671_v50 = vsel %vm184_vm3, %v667_v49, inf }
 0x9a2   : > { %672 = vmin.xlane.f32.xlu0 %v671_v50  ;;  %v612_v51 = vpop.xlane.xlu2 %611  ;;  %v357_v50 = vpop.f32.mrf.mxu1 }
 0x9a3   : > { %v613_v53 = vcvt.f32.s32 %v612_v51 }
 0x9a5   : > { %v616_v54 = vadd.s32 %v615_v52, %v613_v53  ;;  %v433_v53 = vpop.f32.mrf.mxu2 }
 0x9a7   : > { %vm632_vm11 = vcmp.eq.s32.totalorder %v1060_v1, %v616_v54  ;;  %v509_v54 = vpop.f32.mrf.mxu3 }
 0x9a8   : > { %v951_v55 = vsel %vm632_vm11, 1.0, %v1036_v61  ;;  %v666_v56 = vsel %vm632_vm11, 3.4028235e+38, %v590_v22 }
 0x9a9   : > { %954 = vmatpush.xpose.msk.msrb.mxu1 %vm184_vm3, %v951_v55  ;;  %v668_v57 = vsel %vm184_vm3, %v666_v56, inf }
 0x9aa   : > { %669 = vmin.xlane.f32.xlu1 %v668_v57 }
 0x9ac   : > { %955 = vmatmul.msk.f32.vlgmr.msrb.gmra.mxu1 %vm184_vm3, %v1075_v2 }
 0xa15   : > { %v673_v58 = vpop.xlane.xlu0 %672 }
 0xa16   : > { %vm675_vm12 = vcmp.eq.f32.partialorder %v667_v49, %v673_v58 }
 0xa17   : > { %v677_v59 = vsel %vm675_vm12, %v1060_v1, 64 }
 0xa18   : > { %v693_v60 = vsel %vm184_vm3, %v677_v59, 2147483647 }
 0xa19   : > { %v695_v62 = vshra.s32 %v693_v60, 16  ;;  %v694_v7 = vand.u32 65535, %v693_v60 }
 0xa1b   : > { %v697_v63 = vcvt.s32.f32 %v695_v62  ;;  %v696_v9 = vcvt.s32.f32 %v694_v7 }
 0xa1d   : > { %v670_v0 = vpop.xlane.xlu1 %669  ;;  %698 = vmin.xlane.f32.xlu2 %v697_v63 }
 0xa1e   : > { %vm674_vm13 = vcmp.eq.f32.partialorder %v666_v56, %v670_v0 }
 0xa1f   : > { %v676_v3 = vsel %vm674_vm13, %v1060_v1, 64 }
 0xa20   : > { %v678_v4 = vsel %vm184_vm3, %v676_v3, 2147483647 }
 0xa21   : > { %v680_v5 = vshra.s32 %v678_v4, 16  ;;  %v679_v11 = vand.u32 65535, %v678_v4 }
 0xa23   : > { %v682_v6 = vcvt.s32.f32 %v680_v5  ;;  %v681_v13 = vcvt.s32.f32 %v679_v11 }
 0xa25   : > { %683 = vmin.xlane.f32.xlu0 %v682_v6 }
 0xa29   : > { %v661_v58 = vpop.f32.mrf.mxu1 }
 0xa90   : > { %v699_v8 = vpop.xlane.xlu2 %698 }
 0xa91   : > { %vm700_vm14 = vcmp.eq.f32.partialorder %v697_v63, %v699_v8  ;;  %v705_v15 = vcvt.f32.s32 %v699_v8 }
 0xa92   : > { %v701_v10 = vsel %vm700_vm14, %v696_v9, inf }
 0xa93   : > { %702 = vmin.xlane.f32.xlu1 %v701_v10  ;;  %v706_v17 = vshll.u32 %v705_v15, 16 }
 0xa98   : > { %v684_v12 = vpop.xlane.xlu0 %683 }
 0xa99   : > { %vm685_vm15 = vcmp.eq.f32.partialorder %v682_v6, %v684_v12  ;;  %v690_v20 = vcvt.f32.s32 %v684_v12 }
 0xa9a   : > { %v686_v14 = vsel %vm685_vm15, %v681_v13, inf }
 0xa9b   : > { %687 = vmin.xlane.f32.xlu2 %v686_v14  ;;  %v691_v25 = vshll.u32 %v690_v20, 16 }
 0xb06   : > { %v703_v16 = vpop.xlane.xlu1 %702 }
 0xb07   : > { %v704_v18 = vcvt.f32.s32 %v703_v16 }
 0xb09   : > { %v707_v19 = vadd.s32 %v706_v17, %v704_v18 }
 0xb0b   : > { %vm709_vm0 = vcmp.eq.s32.totalorder %v1060_v1, %v707_v19 }
 0xb0c   : > { %v957_v21 = vsel %vm709_vm0, 1.0, %v1036_v61  ;;  %v743_v22 = vsel %vm709_vm0, 3.4028235e+38, %v667_v49  ;;  %v280_v49 = vpop.f32.mrf.mxu0 }
 0xb0d   : > { %958 = vmatpush.xpose.msk.msrb.mxu2 %vm184_vm3, %v957_v21  ;;  %v747_v23 = vsel %vm184_vm3, %v743_v22, inf  ;;  %v283_v51 = vsub.f32 %v280_v49, %v280_v49  ;;  %v360_v52 = vsub.f32 %v357_v50, %v280_v49  ;;  %818 = vst.msk [vmem:[%s1068_s18] sm:$0x7] %vm284_vm7, %v280_v49  ;;  %v436_v55 = vsub.f32 %v433_v53, %v280_v49 }
 0xb0e   : > { %748 = vmin.xlane.f32.xlu0 %v747_v23  ;;  %v688_v24 = vpop.xlane.xlu2 %687  ;;  %v664_v60 = vsub.f32 %v661_v58, %v280_v49 }
 0xb0f   : > { %v689_v26 = vcvt.f32.s32 %v688_v24  ;;  %285 = vst.msk [vmem:[%s1073_s21] sm:$0x7] %vm284_vm7, %v283_v51 }
 0xb10   : > { %361 = vst.msk [vmem:[%s1073_s21 + $0x3] sm:$0x7] %vm284_vm7, %v360_v52 }
 0xb11   : > { %v692_v27 = vadd.s32 %v691_v25, %v689_v26  ;;  %437 = vst.msk [vmem:[%s1073_s21 + $0x6] sm:$0x7] %vm284_vm7, %v436_v55 }
 0xb12   : > { %665 = vst.msk [vmem:[%s1073_s21 + $0xf] sm:$0x7] %vm284_vm7, %v664_v60 }
 0xb13   : > { %vm708_vm1 = vcmp.eq.s32.totalorder %v1060_v1, %v692_v27 }
 0xb14   : > { %v956_v28 = vsel %vm708_vm1, 1.0, %v1036_v61  ;;  %v742_v29 = vsel %vm708_vm1, 3.4028235e+38, %v666_v56  ;;  %v512_v56 = vsub.f32 %v509_v54, %v280_v49  ;;  %v585_v57 = vpop.f32.mrf.mxu0 }
 0xb15   : > { %959 = vmatpush.xpose.msk.msrb.mxu2 %vm184_vm3, %v956_v28  ;;  %v744_v30 = vsel %vm184_vm3, %v742_v29, inf  ;;  %v588_v59 = vsub.f32 %v585_v57, %v280_v49 }
 0xb16   : > { %745 = vmin.xlane.f32.xlu1 %v744_v30  ;;  %513 = vst.msk [vmem:[%s1073_s21 + $0x9] sm:$0x7] %vm284_vm7, %v512_v56 }
 0xb17   : > { %589 = vst.msk [vmem:[%s1073_s21 + $0xc] sm:$0x7] %vm284_vm7, %v588_v59 }
 0xb18   : > { %960 = vmatmul.msk.f32.vlgmr.msrb.gmra.mxu2 %vm184_vm3, %v1075_v2 }
 0xb81   : > { %v749_v31 = vpop.xlane.xlu0 %748 }
 0xb82   : > { %vm751_vm2 = vcmp.eq.f32.partialorder %v743_v22, %v749_v31 }
 0xb83   : > { %v753_v32 = vsel %vm751_vm2, %v1060_v1, 64 }
 0xb84   : > { %v769_v33 = vsel %vm184_vm3, %v753_v32, 2147483647 }
 0xb85   : > { %v771_v34 = vshra.s32 %v769_v33, 16  ;;  %v770_v41 = vand.u32 65535, %v769_v33 }
 0xb87   : > { %v773_v35 = vcvt.s32.f32 %v771_v34  ;;  %v772_v43 = vcvt.s32.f32 %v770_v41 }
 0xb89   : > { %v746_v36 = vpop.xlane.xlu1 %745  ;;  %774 = vmin.xlane.f32.xlu2 %v773_v35 }
 0xb8a   : > { %vm750_vm4 = vcmp.eq.f32.partialorder %v742_v29, %v746_v36 }
 0xb8b   : > { %v752_v37 = vsel %vm750_vm4, %v1060_v1, 64 }
 0xb8c   : > { %v754_v38 = vsel %vm184_vm3, %v752_v37, 2147483647 }
 0xb8d   : > { %v756_v39 = vshra.s32 %v754_v38, 16  ;;  %v755_v45 = vand.u32 65535, %v754_v38 }
 0xb8f   : > { %v758_v40 = vcvt.s32.f32 %v756_v39  ;;  %v757_v47 = vcvt.s32.f32 %v755_v45 }
 0xb91   : > { %759 = vmin.xlane.f32.xlu0 %v758_v40 }
 0xb9b   : > { %v737_v62 = vpop.f32.mrf.mxu2 }
 0xb9c   : > { %v740_v63 = vsub.f32 %v737_v62, %v280_v49 }
 0xb9e   : > { %741 = vst.msk [vmem:[%s1073_s21 + $0x12] sm:$0x7] %vm284_vm7, %v740_v63 }
 0xbfc   : > { %v775_v42 = vpop.xlane.xlu2 %774 }
 0xbfd   : > { %vm776_vm5 = vcmp.eq.f32.partialorder %v773_v35, %v775_v42  ;;  %v781_v0 = vcvt.f32.s32 %v775_v42 }
 0xbfe   : > { %v777_v44 = vsel %vm776_vm5, %v772_v43, inf }
 0xbff   : > { %778 = vmin.xlane.f32.xlu1 %v777_v44  ;;  %v782_v4 = vshll.u32 %v781_v0, 16 }
 0xc04   : > { %v760_v46 = vpop.xlane.xlu0 %759 }
 0xc05   : > { %vm761_vm6 = vcmp.eq.f32.partialorder %v758_v40, %v760_v46  ;;  %v766_v7 = vcvt.f32.s32 %v760_v46 }
 0xc06   : > { %v762_v48 = vsel %vm761_vm6, %v757_v47, inf }
 0xc07   : > { %763 = vmin.xlane.f32.xlu2 %v762_v48  ;;  %v767_v10 = vshll.u32 %v766_v7, 16 }
 0xc72   : > { %v779_v3 = vpop.xlane.xlu1 %778 }
 0xc73   : > { %v780_v5 = vcvt.f32.s32 %v779_v3 }
 0xc75   : > { %v783_v6 = vadd.s32 %v782_v4, %v780_v5 }
 0xc77   : > { %vm785_vm8 = vcmp.eq.s32.totalorder %v1060_v1, %v783_v6 }
 0xc78   : > { %v962_v8 = vsel %vm785_vm8, 1.0, %v1036_v61 }
 0xc79   : > { %963 = vmatpush.xpose.msk.msrb.mxu3 %vm184_vm3, %v962_v8 }
 0xc7a   : > { %v764_v9 = vpop.xlane.xlu2 %763 }
 0xc7b   : > { %v765_v11 = vcvt.f32.s32 %v764_v9 }
 0xc7d   : > { %v768_v12 = vadd.s32 %v767_v10, %v765_v11 }
 0xc7f   : > { %vm784_vm9 = vcmp.eq.s32.totalorder %v1060_v1, %v768_v12 }
 0xc80   : > { %v961_v13 = vsel %vm784_vm9, 1.0, %v1036_v61 }
 0xc81   : > { %964 = vmatpush.xpose.msk.msrb.mxu3 %vm184_vm3, %v961_v13 }
 0xc84   : > { %965 = vmatmul.msk.f32.vlgmr.msrb.gmra.mxu3 %vm184_vm3, %v1075_v2 }
 0xd07   : > { %v813_v14 = vpop.f32.mrf.mxu3 }
 0xd08   : > { %v816_v15 = vsub.f32 %v813_v14, %v280_v49 }
 0xd0a   : > { %817 = vst.msk [vmem:[%s1073_s21 + $0x15] sm:$0x7] %vm284_vm7, %v816_v15 }
 0xd0b PF: > { %s13_s9 = sadd.s32 1, %s1021_s9  }
 0xd0c   : > { %p10_p5 = scmp.ge.s32.totalorder %s13_s9, 4  }
 0xd0e   :  { %12 = sbr.rel (!%p10_p5) target bundleno = 1 (0x1), region = 85 }

</bundles_post_ra>
